<compile_context>
chip_gen: v5e
topology: v5e:2x2
jax: 0.10.0
libtpu: 0.0.40
codegen_flags: <defaults>
</compile_context>

<pallas_src>
import jax
import jax.numpy as jnp
from jax.experimental import pallas as pl
from jax.experimental.pallas import tpu as pltpu


def _round_up(x, m):
    return ((x + m - 1) // m) * m


_VMEM_LIMIT_BYTES = 48 * 1024 * 1024       # <= v7x 64 MiB physical, << v5e/v6e 128 MiB
_RESIDENT_BUDGET_BYTES = 32 * 1024 * 1024  # budget for fully-VMEM-resident weights


# ----------------------------------------------------------------------------
# Kernels
# ----------------------------------------------------------------------------
def _mlp_kernel_resident(x_ref, w1_ref, b1_ref, w2_ref, b2_ref, out_ref):
    """Fast path: both weight matrices fully VMEM-resident across batch tiles."""
    # Layer 1: MXU matmul, f32 accumulate, f32 epilogue (bias + ReLU on VPU).
    h = jnp.dot(x_ref[...], w1_ref[...], preferred_element_type=jnp.float32)
    h = jnp.maximum(h + b1_ref[...], 0.0)
    # Layer 2: cast activation back to the matmul operand dtype (no-op in f32).
    o = jnp.dot(h.astype(w2_ref.dtype), w2_ref[...],
                preferred_element_type=jnp.float32)
    o = jnp.maximum(o + b2_ref[...], 0.0)
    out_ref[...] = o.astype(out_ref.dtype)


def _mlp_kernel_h1_tiled(x_ref, w1_ref, b1_ref, w2_ref, b2_ref, out_ref, acc_ref):
    """VMEM-guard fallback: hidden dim H1 tiled as a reduction axis (grid axis 1)."""
    k = pl.program_id(1)

    @pl.when(k == 0)
    def _():
        acc_ref[...] = jnp.zeros_like(acc_ref)

    h = jnp.dot(x_ref[...], w1_ref[...], preferred_element_type=jnp.float32)
    h = jnp.maximum(h + b1_ref[...], 0.0)
    acc_ref[...] += jnp.dot(h.astype(w2_ref.dtype), w2_ref[...],
                            preferred_element_type=jnp.float32)

    @pl.when(k == pl.num_programs(1) - 1)
    def _():
        out_ref[...] = jnp.maximum(acc_ref[...] + b2_ref[...],
                                   0.0).astype(out_ref.dtype)


# ----------------------------------------------------------------------------
# One-time parameter preparation (hoisted out of the hot path)
# ----------------------------------------------------------------------------
def prepare_mlp_params(w1, b1, w2, b2, *, compute_dtype=jnp.bfloat16):
    """Pad + cast MlpModel parameters once; reuse across forward calls.

    w1: (D, H1), w2: (H1, H2)   (transposed vs PyTorch's (out, in) layout)
    b1: (H1,) or (1, H1); b2: (H2,) or (1, H2)
    compute_dtype: matmul operand dtype (bf16 default — MXU-native on all
                   generations). Accumulation / epilogue are always f32.
    """
    D, H1 = w1.shape
    H1_, H2 = w2.shape
    assert H1_ == H1, "w2 input dim must match w1 output dim"
    b1 = jnp.asarray(b1).reshape(1, H1)
    b2 = jnp.asarray(b2).reshape(1, H2)

    H1p = _round_up(H1, 128)   # lane-dense hidden width
    H2p = _round_up(H2, 128)   # lane-dense output width -> unmasked stores

    # Build padded buffers directly in compute_dtype; zero pads are exact
    # (bias pad is 0 and ReLU keeps padded lanes at exactly 0).
    cdt = jnp.dtype(compute_dtype)
    w1p = jnp.zeros((D, H1p), cdt).at[:, :H1].set(w1.astype(cdt))
    w2p = jnp.zeros((H1p, H2p), cdt).at[:H1, :H2].set(w2.astype(cdt))
    b1p = jnp.zeros((1, H1p), jnp.float32).at[:, :H1].set(b1.astype(jnp.float32))
    b2p = jnp.zeros((1, H2p), jnp.float32).at[:, :H2].set(b2.astype(jnp.float32))

    return dict(w1p=w1p, b1p=b1p, w2p=w2p, b2p=b2p,
                D=D, H1=H1, H2=H2, H1p=H1p, H2p=H2p, compute_dtype=cdt)


# ----------------------------------------------------------------------------
# Forward
# ----------------------------------------------------------------------------
def mlp_forward(params, x, *, tm=None, th1=None, out_dtype=jnp.float32,
                force_h1_tiled=False):
    """Fused MLP forward.  x: (B, D) f32 -> (B, H2) out_dtype."""
    D, H2 = params["D"], params["H2"]
    H1p, H2p = params["H1p"], params["H2p"]
    w1p, b1p, w2p, b2p = params["w1p"], params["b1p"], params["w2p"], params["b2p"]
    compute_dtype = params["compute_dtype"]

    B = x.shape[0]
    assert x.shape == (B, D)

    # ---- batch tile: fill the 256-wide MXU when the batch is big, but keep at
    # least 2 batch tiles whenever B allows (v7x megacore sharding). ----------
    B8 = _round_up(B, 8)
    if tm is None:
        tm = 256 if B8 >= 256 else 128
    TM = min(tm, B8)
    if B8 // TM < 2 and B8 >= 16:
        TM = _round_up(B8 // 2, 8)
    Bp = _round_up(B, TM)

    # Pad only the batch dim of x (last dim stays full-extent: no D padding).
    if Bp == B:
        xp = x.astype(compute_dtype)
    else:
        xp = jnp.zeros((Bp, D), compute_dtype).at[:B, :].set(x.astype(compute_dtype))

    itemsize = compute_dtype.itemsize
    out_itemsize = jnp.dtype(out_dtype).itemsize
    weight_bytes = (w1p.size + w2p.size) * itemsize + (b1p.size + b2p.size) * 4
    act_bytes = 2 * TM * (D * itemsize + H2p * out_itemsize)   # double-buffered tiles
    resident_est = 2 * weight_bytes + act_bytes                # blocks double-buffered

    cost = pl.CostEstimate(
        flops=2 * Bp * (D * H1p + H1p * H2p),
        transcendentals=0,
        bytes_accessed=xp.size * itemsize + weight_bytes + Bp * H2p * out_itemsize,
    )

    def _cparams(sem):
        return pltpu.CompilerParams(dimension_semantics=sem,
                                    vmem_limit_bytes=_VMEM_LIMIT_BYTES)

    if not force_h1_tiled and resident_est <= _RESIDENT_BUDGET_BYTES:
        # Fast path: weights/biases VMEM-resident across all batch tiles.
        out = pl.pallas_call(
            _mlp_kernel_resident,
            out_shape=jax.ShapeDtypeStruct((Bp, H2p), out_dtype),
            grid=(Bp // TM,),
            in_specs=[
                pl.BlockSpec((TM, D), lambda i: (i, 0)),       # activations, tiled
                pl.BlockSpec((D, H1p), lambda i: (0, 0)),      # weights: same block
                pl.BlockSpec((1, H1p), lambda i: (0, 0)),      #   every step -> DMA'd
                pl.BlockSpec((H1p, H2p), lambda i: (0, 0)),    #   once, VMEM-resident
                pl.BlockSpec((1, H2p), lambda i: (0, 0)),
            ],
            out_specs=pl.BlockSpec((TM, H2p), lambda i: (i, 0)),
            compiler_params=_cparams(("parallel",)),
            cost_estimate=cost,
        )(xp, w1p, b1p, w2p, b2p)
    else:
        # VMEM-guard fallback: tile H1 (layer-2 contraction) as an "arbitrary"
        # reduction axis with an f32 VMEM accumulator.
        if th1 is None:
            th1 = next(t for t in (512, 256, 128) if H1p % t == 0)
        assert H1p % th1 == 0
        out = pl.pallas_call(
            _mlp_kernel_h1_tiled,
            out_shape=jax.ShapeDtypeStruct((Bp, H2p), out_dtype),
            grid=(Bp // TM, H1p // th1),
            in_specs=[
                pl.BlockSpec((TM, D), lambda i, k: (i, 0)),
                pl.BlockSpec((D, th1), lambda i, k: (0, k)),
                pl.BlockSpec((1, th1), lambda i, k: (0, k)),
                pl.BlockSpec((th1, H2p), lambda i, k: (k, 0)),
                pl.BlockSpec((1, H2p), lambda i, k: (0, 0)),
            ],
            out_specs=pl.BlockSpec((TM, H2p), lambda i, k: (i, 0)),
            scratch_shapes=[pltpu.VMEM((TM, H2p), jnp.float32)],
            compiler_params=_cparams(("parallel", "arbitrary")),
            cost_estimate=cost,
        )(xp, w1p, b1p, w2p, b2p)
        # TODO(synk): also tile H2p as a third grid axis if a single (th1, H2p)
        # weight block still exceeds the VMEM budget.

    # Slice padded batch / lanes back to the logical shape.
    return out[:B, :H2]


# ----------------------------------------------------------------------------
# Deterministic parameter init matching the PyTorch module:
#   nn.init.orthogonal_(weight, gain=calculate_gain('relu')=sqrt(2))
#   nn.init.constant_(bias, 0)
# ----------------------------------------------------------------------------
def orthogonal(key, out_features, in_features, gain):
    """Orthogonal init for a PyTorch-layout (out, in) weight matrix."""
    rows, cols = out_features, in_features
    flat = jax.random.normal(key, (max(rows, cols), min(rows, cols)),
                             dtype=jnp.float32)
    q, r = jnp.linalg.qr(flat)
    q = q * jnp.sign(jnp.diag(r))   # sign fix so Q is uniquely determined
    if rows < cols:
        q = q.T
    return gain * q[:rows, :cols]


def init_mlp_params(key, input_dims, hidden_dims):
    gain = jnp.sqrt(2.0)  # nn.init.calculate_gain('relu')
    dims = [input_dims] + list(hidden_dims)
    params = []
    for i in range(len(dims) - 1):
        key, sub = jax.random.split(key)
        w_pt = orthogonal(sub, dims[i + 1], dims[i], gain)  # (out, in) PyTorch layout
        w = w_pt.T                                          # (in, out) kernel layout
        b = jnp.zeros((1, dims[i + 1]), dtype=jnp.float32)
        params.append((w, b))
    return params


if __name__ == "__main__":
    input_dims = 4
    hidden_dims = [64, 64]
    batch = 8

    key = jax.random.PRNGKey(0)
    k_params, k_x, k_params2, k_x2 = jax.random.split(key, 4)

    (w1, b1), (w2, b2) = init_mlp_params(k_params, input_dims, hidden_dims)
    x = jax.random.normal(k_x, (batch, input_dims), dtype=jnp.float32)

    # Plain-JAX reference of the same math.
    ref = jnp.maximum(x @ w1 + b1, 0.0)
    ref = jnp.maximum(ref @ w2 + b2, 0.0)

    # f32 operands: exact path (resident weights).
    p_f32 = prepare_mlp_params(w1, b1, w2, b2, compute_dtype=jnp.float32)
    out_f32 = jax.block_until_ready(mlp_forward(p_f32, x))
    assert out_f32.shape == (batch, hidden_dims[-1])
    assert jnp.allclose(out_f32, ref, atol=1e-5, rtol=1e-5)

    # bf16 matmul operands (default on all generations), f32 accumulate,
    # bf16 output writeback.
    p_bf16 = prepare_mlp_params(w1, b1, w2, b2)   # compute_dtype=bfloat16
    out_bf16 = jax.block_until_ready(
        mlp_forward(p_bf16, x, out_dtype=jnp.bfloat16))
    assert out_bf16.shape == (batch, hidden_dims[-1])
    assert jnp.allclose(out_bf16.astype(jnp.float32), ref, atol=3e-2, rtol=3e-2)

    # Exercise the VMEM-guard fallback (H1-tiled reduction + f32 accumulator)
    # at a shape with 2 batch tiles and 2 H1 tiles.
    in2, hid2, batch2 = 12, [256, 96], 32
    (u1, c1), (u2, c2) = init_mlp_params(k_params2, in2, hid2)
    x2 = jax.random.normal(k_x2, (batch2, in2), dtype=jnp.float32)
    ref2 = jnp.maximum(x2 @ u1 + c1, 0.0)
    ref2 = jnp.maximum(ref2 @ u2 + c2, 0.0)
    p2 = prepare_mlp_params(u1, c1, u2, c2, compute_dtype=jnp.float32)
    out2 = jax.block_until_ready(
        mlp_forward(p2, x2, force_h1_tiled=True, th1=128))
    assert out2.shape == (batch2, hid2[-1])
    assert jnp.allclose(out2, ref2, atol=1e-4, rtol=1e-4)

    print("KERNEL_OK")
</pallas_src>

<mosaic_0001>
module attributes {stable_mosaic.version = 11 : i64} {
  func.func @_mlp_kernel_resident(%arg0: i32, %arg1: memref<8x4xf32, #tpu.memory_space<vmem>>, %arg2: memref<4x128xf32, #tpu.memory_space<vmem>>, %arg3: memref<1x128xf32, #tpu.memory_space<vmem>>, %arg4: memref<128x128xf32, #tpu.memory_space<vmem>>, %arg5: memref<1x128xf32, #tpu.memory_space<vmem>>, %arg6: memref<8x128xf32, #tpu.memory_space<vmem>>) attributes {dimension_semantics = [#tpu.dimension_semantics<parallel>], iteration_bounds = array<i64: 1>, scalar_prefetch = 0 : i64, scratch_operands = 0 : i64, tpu.core_type = #tpu.core_type<tc>, window_params = [{transform_indices = @transform_0, window_bounds = array<i64: 8, 4>}, {pipeline_mode = #tpu.pipeline_mode<synchronous>, transform_indices = @transform_1, window_bounds = array<i64: 4, 128>}, {pipeline_mode = #tpu.pipeline_mode<synchronous>, transform_indices = @transform_2, window_bounds = array<i64: 1, 128>}, {pipeline_mode = #tpu.pipeline_mode<synchronous>, transform_indices = @transform_3, window_bounds = array<i64: 128, 128>}, {pipeline_mode = #tpu.pipeline_mode<synchronous>, transform_indices = @transform_4, window_bounds = array<i64: 1, 128>}, {transform_indices = @transform_5, window_bounds = array<i64: 8, 128>}]} {
    %c0 = arith.constant 0 : index
    %c0_0 = arith.constant 0 : index
    %0 = vector.load %arg1[%c0, %c0_0] : memref<8x4xf32, #tpu.memory_space<vmem>>, vector<8x4xf32>
    %c0_1 = arith.constant 0 : index
    %c0_2 = arith.constant 0 : index
    %1 = vector.load %arg2[%c0_1, %c0_2] : memref<4x128xf32, #tpu.memory_space<vmem>>, vector<4x128xf32>
    %cst = arith.constant dense<0.000000e+00> : vector<8x128xf32>
    %2 = tpu.matmul %0, %1, %cst {dimension_numbers = #tpu.dot_dimension_numbers<[1], [0], [0], [1], [0, 0, 1, 1], [], []>} : vector<8x4xf32>, vector<4x128xf32>, vector<8x128xf32> -> vector<8x128xf32>
    %c0_3 = arith.constant 0 : index
    %c0_4 = arith.constant 0 : index
    %3 = vector.load %arg3[%c0_3, %c0_4] : memref<1x128xf32, #tpu.memory_space<vmem>>, vector<1x128xf32>
    %4 = vector.broadcast %3 : vector<1x128xf32> to vector<8x128xf32>
    %5 = arith.addf %2, %4 : vector<8x128xf32>
    %cst_5 = arith.constant 0.000000e+00 : f32
    %6 = vector.broadcast %cst_5 : f32 to vector<8x128xf32>
    %7 = arith.maximumf %5, %6 : vector<8x128xf32>
    %c0_6 = arith.constant 0 : index
    %c0_7 = arith.constant 0 : index
    %8 = vector.load %arg4[%c0_6, %c0_7] : memref<128x128xf32, #tpu.memory_space<vmem>>, vector<128x128xf32>
    %cst_8 = arith.constant dense<0.000000e+00> : vector<8x128xf32>
    %9 = tpu.matmul %7, %8, %cst_8 {dimension_numbers = #tpu.dot_dimension_numbers<[1], [0], [0], [1], [0, 0, 1, 1], [], []>} : vector<8x128xf32>, vector<128x128xf32>, vector<8x128xf32> -> vector<8x128xf32>
    %c0_9 = arith.constant 0 : index
    %c0_10 = arith.constant 0 : index
    %10 = vector.load %arg5[%c0_9, %c0_10] : memref<1x128xf32, #tpu.memory_space<vmem>>, vector<1x128xf32>
    %11 = vector.broadcast %10 : vector<1x128xf32> to vector<8x128xf32>
    %12 = arith.addf %9, %11 : vector<8x128xf32>
    %cst_11 = arith.constant 0.000000e+00 : f32
    %13 = vector.broadcast %cst_11 : f32 to vector<8x128xf32>
    %14 = arith.maximumf %12, %13 : vector<8x128xf32>
    %c0_12 = arith.constant 0 : index
    %c0_13 = arith.constant 0 : index
    %15 = vector.load %arg6[%c0_12, %c0_13] : memref<8x128xf32, #tpu.memory_space<vmem>>, vector<8x128xf32>
    tpu.vector_store %arg6[%c0_12, %c0_13], %14 {strides = array<i32>} : memref<8x128xf32, #tpu.memory_space<vmem>>, vector<8x128xf32>,
    return
  }
  func.func @transform_0(%arg0: i32) -> (i32, i32) {
    %c0_i32 = arith.constant 0 : i32
    %c0_i32_0 = arith.constant 0 : i32
    return %arg0, %c0_i32 : i32, i32
  }
  func.func @transform_1(%arg0: i32) -> (i32, i32) {
    %c0_i32 = arith.constant 0 : i32
    %c0_i32_0 = arith.constant 0 : i32
    %c0_i32_1 = arith.constant 0 : i32
    return %c0_i32, %c0_i32_0 : i32, i32
  }
  func.func @transform_2(%arg0: i32) -> (i32, i32) {
    %c0_i32 = arith.constant 0 : i32
    %c0_i32_0 = arith.constant 0 : i32
    %c0_i32_1 = arith.constant 0 : i32
    return %c0_i32, %c0_i32_0 : i32, i32
  }
  func.func @transform_3(%arg0: i32) -> (i32, i32) {
    %c0_i32 = arith.constant 0 : i32
    %c0_i32_0 = arith.constant 0 : i32
    %c0_i32_1 = arith.constant 0 : i32
    return %c0_i32, %c0_i32_0 : i32, i32
  }
  func.func @transform_4(%arg0: i32) -> (i32, i32) {
    %c0_i32 = arith.constant 0 : i32
    %c0_i32_0 = arith.constant 0 : i32
    %c0_i32_1 = arith.constant 0 : i32
    return %c0_i32, %c0_i32_0 : i32, i32
  }
  func.func @transform_5(%arg0: i32) -> (i32, i32) {
    %c0_i32 = arith.constant 0 : i32
    %c0_i32_0 = arith.constant 0 : i32
    return %arg0, %c0_i32 : i32, i32
  }
}

</mosaic_0001>

<bundles_post_ra>
// kernel: tpu_custom_call.1
= control target key start
LH: loop header
LB: loop body
LE: loop exit
PB: predicated region body
PF: predicated region fallthrough
CT: control target
= control target key end

     0   :  { %10 = vsyncpa [#allocation3], 0  ;;  %s243_s0 = inlined_call_operand.vmem [shape: f32[8,4], index: 0, kind: input, shape index: {}]   ;;  %s244_s1 = inlined_call_operand.vmem [shape: f32[4,128], index: 1, kind: input, shape index: {}]   ;;  %s245_s2 = inlined_call_operand.vmem [shape: f32[1,128], index: 2, kind: input, shape index: {}]   ;;  %s246_s3 = inlined_call_operand.hbm [shape: f32[128,128], index: 3, kind: input, shape index: {}]   ;;  %s247_s4 = inlined_call_operand.vmem [shape: f32[1,128], index: 4, kind: input, shape index: {}]   ;;  %s248_s5 = inlined_call_operand.hbm [shape: f32[8,128], index: 5, kind: output, shape index: {}]  }
   0x1   :  { %11 = vsyncpa [#allocation4], 0  ;;  %s22_s20 = sshll.u32 %s246_s3, 4  ;;  %s191_s21 = smov [#allocation2]   ;;  %s23_s20 = int_to_ptr.hbm [resolvable:$true] %s22_s20 }
   0x2   :  { %s24_s22 = sshll.u32 %s191_s21, 4  ;;  %s192_s23 = smov 128   ;;  %s25_s22 = int_to_ptr.vmem [resolvable:$true] %s24_s22 }
   0x3   :  { %s193_s24 = smov 8  }
   0x4   :  { %30 = dma.hbm_to_vmem [thread:$0]  %s23_s20, 2048, %s25_s22, [#allocation3], %s192_s23, %s192_s23, %s193_s24  }
   0x5   :  { %187 = dma.done.wait [#allocation3], 2048  }
   0x6   :  { %188 = vsyncadd [#allocation3], 4294965248  ;;  %vm47_vm0 = vcmask 1043456   ;;  %vm43_vm1 = vcmask 31744   ;;  %v38_v0 = vld [vmem:[%s244_s1] sm:$0xf] }
   0x7   :  { %v37_v1 = vld [vmem:[%s243_s0] sm:$0xff]  ;;  %v87_v2 = vld [vmem:[#allocation2 + $0x78] sm:$0xff]  ;;  %131 = vmatpush.msk.msra.mxu0 %vm47_vm0, %v38_v0  ;;  %v86_v3 = vld [vmem:[#allocation2 + $0x70] sm:$0xff]  ;;  %s194_s30 = smov [#allocation5]   ;;  %s121_s9 = sshll.u32 %s248_s5, 4  ;;  %s122_s9 = int_to_ptr.hbm [resolvable:$true] %s121_s9 }
   0x8   :  { %92 = vmatpush.msra.mxu1 %v87_v2  ;;  %132 = vmatmul.msk.f32.vlgmr.msra.gmra.mxu0 %vm43_vm1, %v37_v1  ;;  %v85_v4 = vld [vmem:[#allocation2 + $0x68] sm:$0xff]  ;;  %v84_v5 = vld [vmem:[#allocation2 + $0x60] sm:$0xff]  ;;  %v83_v6 = vld [vmem:[#allocation2 + $0x58] sm:$0xff]  ;;  %s119_s6 = sshll.u32 %s194_s30, 4  ;;  %s120_s6 = int_to_ptr.vmem [resolvable:$true] %s119_s6 }
   0x9   :  { %v82_v7 = vld [vmem:[#allocation2 + $0x50] sm:$0xff]  ;;  %v81_v8 = vld [vmem:[#allocation2 + $0x48] sm:$0xff]  ;;  %v80_v9 = vld [vmem:[#allocation2 + $0x40] sm:$0xff] }
   0xa   :  { %93 = vmatpush.msra.mxu1 %v86_v3  ;;  %v79_v10 = vld [vmem:[#allocation2 + $0x38] sm:$0xff]  ;;  %v78_v11 = vld [vmem:[#allocation2 + $0x30] sm:$0xff]  ;;  %v77_v12 = vld [vmem:[#allocation2 + $0x28] sm:$0xff] }
   0xb   :  { %v76_v13 = vld [vmem:[#allocation2 + $0x20] sm:$0xff]  ;;  %v75_v14 = vld [vmem:[#allocation2 + $0x18] sm:$0xff]  ;;  %v74_v15 = vld [vmem:[#allocation2 + $0x10] sm:$0xff] }
   0xc   :  { %94 = vmatpush.msra.mxu1 %v85_v4  ;;  %v73_v16 = vld [vmem:[#allocation2 + $0x8] sm:$0xff]  ;;  %v72_v17 = vld [vmem:[#allocation2] sm:$0xff] }
   0xd   :  { %v137_v18 = vld [vmem:[%s245_s2] ss:$0 sm:$0xff] }
   0xe   :  { %95 = vmatpush.msra.mxu1 %v84_v5  ;;  %v138_v22 = vld [vmem:[%s247_s4] ss:$0 sm:$0xff] }
  0x10   :  { %96 = vmatpush.msra.mxu1 %v83_v6 }
  0x12   :  { %97 = vmatpush.msra.mxu1 %v82_v7 }
  0x14   :  { %98 = vmatpush.msra.mxu1 %v81_v8 }
  0x16   :  { %99 = vmatpush.msra.mxu1 %v80_v9 }
  0x18   :  { %100 = vmatpush.msra.mxu1 %v79_v10 }
  0x1a   :  { %101 = vmatpush.msra.mxu1 %v78_v11 }
  0x1c   :  { %102 = vmatpush.msra.mxu1 %v77_v12 }
  0x1e   :  { %103 = vmatpush.msra.mxu1 %v76_v13 }
  0x20   :  { %104 = vmatpush.msra.mxu1 %v75_v14 }
  0x22   :  { %105 = vmatpush.msra.mxu1 %v74_v15 }
  0x24   :  { %106 = vmatpush.msra.mxu1 %v73_v16 }
  0x26   :  { %107 = vmatpush.msra.mxu1 %v72_v17 }
  0x85   :  { %v68_v19 = vpop.f32.mrf.mxu0 }
  0x86   :  { %v69_v20 = vadd.f32 %v137_v18, %v68_v19 }
  0x88   :  { %v71_v21 = vmax.f32 %v69_v20, 0.0 }
  0x8a   :  { %108 = vmatmul.f32.vlgmr.msra.gmra.mxu1 %v71_v21 }
 0x107   :  { %v109_v23 = vpop.f32.mrf.mxu1 }
 0x108   :  { %v110_v24 = vadd.f32 %v138_v22, %v109_v23 }
 0x10a   :  { %v112_v25 = vmax.f32 %v110_v24, 0.0 }
 0x10c   :  { %113 = vst [vmem:[#allocation5] sm:$0xff] %v112_v25 }
 0x10d   :  { %124 = dma.vmem_to_hbm [thread:$0]  %s120_s6, 128, %s122_s9, [#allocation4]  }
 0x10e   :  { %189 = dma.done.wait [#allocation4], 128  }
 0x10f   :  { %190 = vsyncadd [#allocation4], 4294967168 }
 0x110   :  { %129 = vsyncpa [#allocation3], 1 }
 0x111   :  { %130 = vsyncpa [#allocation4], 1 }

</bundles_post_ra>
